<compile_context>
chip_gen: v7x
topology: tpu7x:2x2x1
jax: 0.10.0
libtpu: 0.0.40
codegen_flags: <defaults>
</compile_context>

<pallas_src>
import math
import functools

import jax
import jax.numpy as jnp
from jax.experimental import pallas as pl
from jax.experimental.pallas import tpu as pltpu


def _build_pe(d_model: int, max_len: int, dtype=jnp.float32) -> jnp.ndarray:
    """Sinusoidal positional-encoding buffer, shape (max_len, 1, d_model) (torch layout)."""
    position = jnp.arange(0, max_len, dtype=jnp.float32)[:, None]              # (max_len, 1)
    div_term = jnp.exp(jnp.arange(0, d_model, 2, dtype=jnp.float32)
                       * (-math.log(10000.0) / d_model))                       # (d_model/2,)
    angles = position * div_term                                               # (max_len, d_model/2)
    pe = jnp.zeros((max_len, d_model), dtype=jnp.float32)
    pe = pe.at[:, 0::2].set(jnp.sin(angles))
    pe = pe.at[:, 1::2].set(jnp.cos(angles))
    # matches torch: pe.unsqueeze(0).transpose(0, 1) -> (max_len, 1, d_model)
    return pe[:, None, :].astype(dtype)


def _pe_add_kernel(x_ref, pe_ref, o_ref, *, batch: int):
    # x_ref/o_ref: (block_s, B*D), pe_ref: (block_s, D).
    # Broadcast pe across the batch by tiling along the lane axis (cheap VMEM
    # lane-concat; the kernel is HBM-bandwidth bound so this is hidden).
    pe_row = pe_ref[...]
    if batch > 1:
        pe_row = jnp.concatenate([pe_row] * batch, axis=-1)      # (block_s, B*D)
    o_ref[...] = (x_ref[...] + pe_row.astype(x_ref.dtype)).astype(o_ref.dtype)


def _choose_block_s(S: int, row_bytes: int, target_tile_bytes: int = 2 << 20) -> int:
    """Sequence-tile size: ~2 MiB x-tiles, multiple of 8, >=2 grid steps when possible."""
    if S <= 8:
        return S                                   # full dim (allowed by BlockSpec rules)
    bs = max(8, min(S, target_tile_bytes // max(row_bytes, 1)))
    bs = min(bs, max(8, -(-S // 2)))               # ensure >= 2 grid steps (pipelining, v7x 2 TCs)
    bs = max(8, (bs // 8) * 8)                     # sublane-aligned tile rows
    return int(bs)


def positional_encoding_forward(x: jnp.ndarray, pe: jnp.ndarray,
                                *, block_s: int | None = None) -> jnp.ndarray:
    """x: (S, B, D); pe: (max_len, 1, D). Returns x + pe[:S] (dropout p=0.0 is identity)."""
    S, B, D = x.shape
    max_len = pe.shape[0]
    if S > max_len:
        raise ValueError(f"sequence length {S} exceeds max_len {max_len}")

    # Lane-dense 2D views: x/out as (S, B*D), pe as (S, D) in x.dtype.
    x2 = x.reshape(S, B * D)
    pe_s = pe[:S, 0, :].astype(x.dtype)

    itemsize = jnp.dtype(x.dtype).itemsize
    row_bytes = B * D * itemsize
    if block_s is None:
        block_s = _choose_block_s(S, row_bytes)
    grid = (pl.cdiv(S, block_s),)

    cost = pl.CostEstimate(
        flops=S * B * D,
        transcendentals=0,
        bytes_accessed=2 * S * B * D * itemsize + S * D * itemsize,
    )

    out2 = pl.pallas_call(
        functools.partial(_pe_add_kernel, batch=B),
        out_shape=jax.ShapeDtypeStruct((S, B * D), x.dtype),
        grid=grid,
        in_specs=[
            pl.BlockSpec((block_s, B * D), lambda i: (i, 0)),
            pl.BlockSpec((block_s, D), lambda i: (i, 0)),
        ],
        out_specs=pl.BlockSpec((block_s, B * D), lambda i: (i, 0)),
        input_output_aliases={0: 0},               # elementwise: write back in place when possible
        cost_estimate=cost,
        compiler_params=pltpu.CompilerParams(
            dimension_semantics=("parallel",),
            vmem_limit_bytes=32 * 1024 * 1024,     # explicit budget, safe on v5e/v6e/v7x
        ),
    )(x2, pe_s)
    return out2.reshape(S, B, D)


class PositionalEncodingPallas:
    """Mirror of the PyTorch PositionalEncoding module (dropout p=0.0 -> identity)."""

    def __init__(self, d_model: int, dropout: float = 0.0, max_len: int = 5000):
        # TODO(synk): non-zero dropout would need pltpu.prng_* masking inside the kernel;
        # the module default p=0.0 is an identity, so it is not implemented here.
        if dropout != 0.0:
            raise NotImplementedError("dropout > 0 not implemented in the Pallas kernel")
        self.dropout_p = dropout
        self.max_len = max_len
        self.pe = _build_pe(d_model, max_len)      # kept in f32; cast to x.dtype per call

    def __call__(self, x: jnp.ndarray) -> jnp.ndarray:
        return positional_encoding_forward(x, self.pe)


if __name__ == "__main__":
    seq, batch, d_model = 8, 2, 32
    key = jax.random.PRNGKey(0)
    x = jax.random.normal(key, (seq, batch, d_model), dtype=jnp.float32)

    module = PositionalEncodingPallas(d_model=d_model, dropout=0.0, max_len=5000)

    # reference computed first (plain JAX), then the Pallas kernel
    ref = x + module.pe[:seq].astype(x.dtype)

    out = module(x)
    out = jax.block_until_ready(out)

    assert out.shape == (seq, batch, d_model)
    assert out.dtype == x.dtype
    assert jnp.allclose(out, ref, atol=1e-6, rtol=1e-6)

    print("KERNEL_OK")
</pallas_src>

<mosaic_0001>
module attributes {stable_mosaic.version = 11 : i64} {
  func.func @_pe_add_kernel(%arg0: i32, %arg1: memref<8x64xf32, #tpu.memory_space<vmem>>, %arg2: memref<8x32xf32, #tpu.memory_space<vmem>>, %arg3: memref<8x64xf32, #tpu.memory_space<vmem>>) attributes {dimension_semantics = [#tpu.dimension_semantics<parallel>], iteration_bounds = array<i64: 1>, scalar_prefetch = 0 : i64, scratch_operands = 0 : i64, tpu.core_type = #tpu.core_type<tc>, window_params = [{transform_indices = @transform_0, window_bounds = array<i64: 8, 64>}, {transform_indices = @transform_1, window_bounds = array<i64: 8, 32>}, {transform_indices = @transform_2, window_bounds = array<i64: 8, 64>}]} {
    %c0 = arith.constant 0 : index
    %c0_0 = arith.constant 0 : index
    %0 = vector.load %arg2[%c0, %c0_0] : memref<8x32xf32, #tpu.memory_space<vmem>>, vector<8x32xf32>
    %1 = tpu.concatenate %0, %0 in 1 : vector<8x32xf32>, vector<8x32xf32> -> vector<8x64xf32>
    %c0_1 = arith.constant 0 : index
    %c0_2 = arith.constant 0 : index
    %2 = vector.load %arg1[%c0_1, %c0_2] : memref<8x64xf32, #tpu.memory_space<vmem>>, vector<8x64xf32>
    %3 = arith.addf %2, %1 : vector<8x64xf32>
    %c0_3 = arith.constant 0 : index
    %c0_4 = arith.constant 0 : index
    %4 = vector.load %arg3[%c0_3, %c0_4] : memref<8x64xf32, #tpu.memory_space<vmem>>, vector<8x64xf32>
    tpu.vector_store %arg3[%c0_3, %c0_4], %3 {strides = array<i32>} : memref<8x64xf32, #tpu.memory_space<vmem>>, vector<8x64xf32>,
    return
  }
  func.func @transform_0(%arg0: i32) -> (i32, i32) {
    %c0_i32 = arith.constant 0 : i32
    %c0_i32_0 = arith.constant 0 : i32
    return %arg0, %c0_i32 : i32, i32
  }
  func.func @transform_1(%arg0: i32) -> (i32, i32) {
    %c0_i32 = arith.constant 0 : i32
    %c0_i32_0 = arith.constant 0 : i32
    return %arg0, %c0_i32 : i32, i32
  }
  func.func @transform_2(%arg0: i32) -> (i32, i32) {
    %c0_i32 = arith.constant 0 : i32
    %c0_i32_0 = arith.constant 0 : i32
    return %arg0, %c0_i32 : i32, i32
  }
}

</mosaic_0001>

<bundles_post_ra>
// kernel: tpu_custom_call.1
= control target key start
LH: loop header
LB: loop body
LE: loop exit
PB: predicated region body
PF: predicated region fallthrough
CT: control target
= control target key end

     0   :  { %7 = vsyncpa [#allocation3], 0  ;;  %s146_s0 = inlined_call_operand.hbm [shape: f32[8,64], index: 0, kind: input, shape index: {}, may-alias: {0,2}]   ;;  %s147_s1 = inlined_call_operand.vmem [shape: f32[8,32], index: 1, kind: input, shape index: {}]   ;;  %s148_s2 = inlined_call_operand.hbm [shape: f32[8,64], index: 2, kind: output, shape index: {}, may-alias: {0,2}]  }
   0x1   :  { %8 = vsyncpa [#allocation4], 0  ;;  %s101_s9 = smov [#allocation2]   ;;  %s53_s13 = scalar_lea.hbm %s146_s0, 128 }
   0x2   :  { %s15_s10 = sshll.u32 %s101_s9, 4  ;;  %p54_p0 = scmp.ne.s32.totalorder %s146_s0, %s53_s13  ;;  %s16_s10 = int_to_ptr.vmem [resolvable:$true] %s15_s10 }
   0x3   :  { %p57_p1 = scmp.lt.u32.totalorder %s53_s13, %s146_s0 }
   0x5   :  { %p59_p2 = pnand %p57_p1, %p54_p0 }
   0x7   :  { %62 = shalt.err (!%p59_p2)
}
   0x8   :  { %s63_s18 = scalar_lea.vmem %s16_s10, 128  ;;  %p68_p4 = scmp.lt.s32.totalorder %s16_s10, %s16_s10 }
   0x9   :  { %p64_p3 = scmp.ne.s32.totalorder %s16_s10, %s63_s18  ;;  %p69_p5 = scmp.lt.s32.totalorder %s63_s18, %s63_s18 }
   0xb   :  { %p70_p6 = por %p69_p5, %p68_p4 }
   0xd   :  { %p71_p7 = pnand %p70_p6, %p64_p3 }
   0xf   :  { %74 = shalt.err (!%p71_p7)
}
  0x10   :  { %18 = dma.hbm_to_vmem [thread:$0]  %s146_s0, 128, %s16_s10, [#allocation3]  }
  0x11   :  { %97 = dma.done.wait [#allocation3], 128  }
  0x12   :  { %98 = vsyncadd [#allocation3], 4294967168  ;;  %v24_v0 = vld [vmem:[%s147_s1] sm:$0xff]  ;;  %s102_s23 = smov 32   ;;  %vm29_vm0 = vcmask 261120   ;;  %s103_s24 = smov [#allocation5]  }
  0x13   :  { %26 = vrot.lane.b32.xlu0 %v24_v0, %s102_s23  ;;  %v31_v1 = vld [vmem:[#allocation2] sm:$0xff]  ;;  %s41_s25 = sshll.u32 %s103_s24, 4  ;;  %vm33_vm1 = vcmask 523264   ;;  %s42_s25 = int_to_ptr.vmem [resolvable:$true] %s41_s25 }
  0x14   :  { %s75_s26 = scalar_lea.vmem %s42_s25, 128  ;;  %p80_p9 = scmp.lt.s32.totalorder %s42_s25, %s42_s25 }
  0x15   :  { %p76_p8 = scmp.ne.s32.totalorder %s42_s25, %s75_s26  ;;  %p81_p10 = scmp.lt.s32.totalorder %s75_s26, %s75_s26 }
  0x17   :  { %p82_p11 = por %p81_p10, %p80_p9 }
  0x19   :  { %p83_p12 = pnand %p82_p11, %p76_p8 }
  0x85   :  { %v27_v2 = vpop.permute.xlu0 %26 }
  0x86   :  { %v30_v3 = vsel %vm29_vm0, %v24_v0, %v27_v2 }
  0x87   :  { %v32_v4 = vadd.f32 %v31_v1, %v30_v3 }
  0x89   :  { %34 = vst.msk [vmem:[#allocation5] sm:$0xff] %vm33_vm1, %v32_v4 }
  0x8a   :  { %86 = shalt.err (!%p83_p12)
}
  0x8b   :  { %s87_s27 = scalar_lea.hbm %s148_s2, 128 }
  0x8c   :  { %p88_p13 = scmp.ne.s32.totalorder %s148_s2, %s87_s27  ;;  %p91_p0 = scmp.lt.u32.totalorder %s87_s27, %s148_s2 }
  0x8e   :  { %p93_p1 = pnand %p91_p0, %p88_p13 }
  0x90   :  { %96 = shalt.err (!%p93_p1)
}
  0x91   :  { %44 = dma.vmem_to_hbm [thread:$0]  %s42_s25, 128, %s148_s2, [#allocation4]  }
  0x92   :  { %99 = dma.done.wait [#allocation4], 128  }
  0x93   :  { %100 = vsyncadd [#allocation4], 4294967168 }
  0x94   :  { %48 = vsyncpa [#allocation3], 1 }
  0x95   :  { %49 = vsyncpa [#allocation4], 1 }

</bundles_post_ra>
